<compile_context>
chip_gen: v7x
topology: tpu7x:2x2x1
jax: 0.10.0
libtpu: 0.0.40
codegen_flags: <defaults>
</compile_context>

<pallas_src>
import math

import jax
import jax.numpy as jnp
from jax.experimental import pallas as pl
from jax.experimental.pallas import tpu as pltpu


def _droplayer_kernel(x_ref, m_ref, o_ref):
    """x_ref/o_ref: VMEM (TR, TC); m_ref: VMEM (TR, 1) fp32 scaled mask."""
    x = x_ref[...]
    if x.dtype == jnp.float32:
        o_ref[...] = x * m_ref[...]
    else:
        # Sub-32-bit path (e.g. bf16): multiply in the native dtype to avoid a
        # widen/narrow per packed vreg; only the tiny (TR, 1) mask is cast.
        o_ref[...] = x * m_ref[...].astype(x.dtype)


def _tile_byte_target():
    """HBM-BW-aware per-tile byte target."""
    try:
        kind = jax.devices()[0].device_kind.lower()
    except Exception:
        kind = ""
    if "v7" in kind or "7x" in kind:
        return 4 << 20   # v7x: ~3.2 TB/s per TC -> amortize per-step overhead
    if "v6" in kind:
        return 4 << 20   # v6e: ~86% of roofline at 4 MiB tiles
    return 2 << 20       # v5e / unknown: keep VMEM pressure lower


def _choose_tiles(rows, cols, itemsize, target):
    """Pick (row_tile, col_tile): (sublane,128)-legal, ~`target` bytes per x tile."""
    row_pack = {4: 8, 2: 16, 1: 32}.get(itemsize, 8)

    # Lane (last-dim) tile: full extent if it fits, else a multiple of 128.
    if cols * row_pack * itemsize <= target:
        tc = cols
    else:
        tc = max(128, (target // (row_pack * itemsize)) // 128 * 128)

    # Sublane (row) tile: multiple of the packing, or the full row extent.
    if rows <= row_pack:
        tr = rows
    else:
        tr = max(row_pack, (target // (tc * itemsize)) // row_pack * row_pack)
        if tr >= rows:
            tr = rows

    # Keep >= 2 grid steps when the slab is big enough so megacore / the two
    # v7x TensorCores can split the work (only triggers when grid would be 1x1).
    if pl.cdiv(rows, tr) * pl.cdiv(cols, tc) < 2 and rows * cols * itemsize >= (2 << 20):
        if tr == rows and rows >= 2 * row_pack:
            tr = (rows // 2) // row_pack * row_pack
        elif tc == cols and cols % 256 == 0:
            tc = cols // 2
    return tr, tc


def droplayer_forward(x, key, *, channel_num=None, threshold=0.3, training=True):
    """x: (B, C, D, H, W). Returns x * scaled-random-channel-mask (training)."""
    if not training:
        return x

    B, C = x.shape[0], x.shape[1]
    spatial = x.shape[2:]
    if channel_num is None:
        channel_num = C
    assert channel_num in (1, C), \
        "channel_num must be 1 or equal to C (torch broadcast rule)"

    S = math.prod(spatial)

    # Scaled per-channel mask, computed once in plain XLA (B*channel_num
    # elements), matching torch: r_bin * channel_num / (r_bin.sum() + 0.01).
    # TODO(synk): torch.rand's CUDA RNG stream is replaced by jax.random here.
    r = jax.random.uniform(key, (B, channel_num), dtype=jnp.float32)
    r_bin = (r >= threshold).astype(jnp.float32)
    scale = jnp.float32(channel_num) / (r_bin.sum() + jnp.float32(0.01))
    m = r_bin * scale

    if channel_num == 1:
        # Fast path: one mask value per batch row -> fold channels into the
        # lane axis for longer contiguous rows and fewer grid steps.
        rows, cols = B, C * S
    else:
        rows, cols = B * C, S
    m = m.reshape(rows, 1)                     # (rows, 1) fp32 column

    x2 = x.reshape(rows, cols)
    itemsize = jnp.dtype(x.dtype).itemsize
    tr, tc = _choose_tiles(rows, cols, itemsize, _tile_byte_target())
    grid = (pl.cdiv(rows, tr), pl.cdiv(cols, tc))

    out = pl.pallas_call(
        _droplayer_kernel,
        out_shape=jax.ShapeDtypeStruct((rows, cols), x.dtype),
        grid_spec=pl.GridSpec(
            grid=grid,
            in_specs=[
                pl.BlockSpec((tr, tc), lambda i, j: (i, j)),   # x tile
                pl.BlockSpec((tr, 1), lambda i, j: (i, 0)),    # mask column
            ],
            out_specs=pl.BlockSpec((tr, tc), lambda i, j: (i, j)),
        ),
        compiler_params=pltpu.CompilerParams(
            dimension_semantics=("parallel", "parallel"),
            vmem_limit_bytes=32 * 1024 * 1024,
        ),
        cost_estimate=pl.CostEstimate(
            flops=rows * cols,
            transcendentals=0,
            bytes_accessed=2 * rows * cols * itemsize + rows * 4,
        ),
        input_output_aliases={0: 0},
    )(x2, m)

    return out.reshape(x.shape)


def _reference(x, r, channel_num, threshold):
    r_bin = (r >= threshold).astype(jnp.float32)
    scale = channel_num / (r_bin.sum() + 0.01)
    m = (r_bin * scale).reshape(x.shape[0], channel_num, 1, 1, 1)
    return x.astype(jnp.float32) * m


if __name__ == "__main__":
    key = jax.random.PRNGKey(0)
    kx, kr, kx2, kr2, kx3 = jax.random.split(key, 5)

    # Small 5-D input consistent with the 3-D conv network this module lives in.
    B, C, D, H, W = 2, 4, 8, 8, 8
    channel_num, threshold = C, 0.3
    x = jax.random.normal(kx, (B, C, D, H, W), dtype=jnp.float32)

    # References are computed from the same uniforms BEFORE the kernel runs.
    r = jax.random.uniform(kr, (B, channel_num), dtype=jnp.float32)
    ref = _reference(x, r, channel_num, threshold)

    out = droplayer_forward(x, kr, channel_num=channel_num,
                            threshold=threshold, training=True)
    out = jax.block_until_ready(out)
    assert out.shape == x.shape
    assert jnp.allclose(out, ref, atol=1e-5, rtol=1e-5), \
        "mismatch vs reference (per-channel mask)"

    # channel_num=1 fast path + odd (non-128-multiple) spatial size.
    x_odd = jax.random.normal(kx2, (2, 4, 5, 6, 7), dtype=jnp.float32)
    r_odd = jax.random.uniform(kr2, (2, 1), dtype=jnp.float32)
    ref_odd = _reference(x_odd, r_odd, 1, threshold)
    out_odd = jax.block_until_ready(
        droplayer_forward(x_odd, kr2, channel_num=1,
                          threshold=threshold, training=True))
    assert jnp.allclose(out_odd, ref_odd, atol=1e-5, rtol=1e-5), \
        "mismatch vs reference (channel_num=1 fast path / odd spatial)"

    # Per-channel mask with a non-128-multiple spatial extent (partial lanes).
    r_odd4 = jax.random.uniform(kr2, (2, 4), dtype=jnp.float32)
    ref_odd4 = _reference(x_odd, r_odd4, 4, threshold)
    out_odd4 = jax.block_until_ready(
        droplayer_forward(x_odd, kr2, channel_num=4,
                          threshold=threshold, training=True))
    assert jnp.allclose(out_odd4, ref_odd4, atol=1e-5, rtol=1e-5), \
        "mismatch vs reference (channel_num=C / odd spatial)"

    # bf16 path (native-dtype multiply in the kernel; one bf16 mask rounding).
    x_bf = jax.random.normal(kx3, (B, C, D, H, W), dtype=jnp.bfloat16)
    r_bf = jax.random.uniform(kr, (B, C), dtype=jnp.float32)
    ref_bf = _reference(x_bf, r_bf, C, threshold)
    out_bf = jax.block_until_ready(
        droplayer_forward(x_bf, kr, channel_num=C,
                          threshold=threshold, training=True))
    assert jnp.allclose(out_bf.astype(jnp.float32), ref_bf,
                        atol=5e-2, rtol=5e-2), "mismatch vs reference (bf16)"

    # Eval mode is the identity.
    out_eval = droplayer_forward(x, kr, training=False)
    assert jnp.array_equal(out_eval, x)

    print("KERNEL_OK")
</pallas_src>

<mosaic_0001>
module attributes {stable_mosaic.version = 11 : i64} {
  func.func @_droplayer_kernel(%arg0: i32, %arg1: i32, %arg2: memref<8x512xf32, #tpu.memory_space<vmem>>, %arg3: memref<8x1xf32, #tpu.memory_space<vmem>>, %arg4: memref<8x512xf32, #tpu.memory_space<vmem>>) attributes {dimension_semantics = [#tpu.dimension_semantics<parallel>, #tpu.dimension_semantics<parallel>], iteration_bounds = array<i64: 1, 1>, scalar_prefetch = 0 : i64, scratch_operands = 0 : i64, tpu.core_type = #tpu.core_type<tc>, window_params = [{transform_indices = @transform_0, window_bounds = array<i64: 8, 512>}, {transform_indices = @transform_1, window_bounds = array<i64: 8, 1>}, {transform_indices = @transform_2, window_bounds = array<i64: 8, 512>}]} {
    %c0 = arith.constant 0 : index
    %c0_0 = arith.constant 0 : index
    %0 = vector.load %arg2[%c0, %c0_0] : memref<8x512xf32, #tpu.memory_space<vmem>>, vector<8x512xf32>
    %c0_1 = arith.constant 0 : index
    %c0_2 = arith.constant 0 : index
    %1 = vector.load %arg3[%c0_1, %c0_2] : memref<8x1xf32, #tpu.memory_space<vmem>>, vector<8x1xf32>
    %2 = vector.broadcast %1 : vector<8x1xf32> to vector<8x512xf32>
    %3 = arith.mulf %0, %2 : vector<8x512xf32>
    %c0_3 = arith.constant 0 : index
    %c0_4 = arith.constant 0 : index
    %4 = vector.load %arg4[%c0_3, %c0_4] : memref<8x512xf32, #tpu.memory_space<vmem>>, vector<8x512xf32>
    tpu.vector_store %arg4[%c0_3, %c0_4], %3 {strides = array<i32>} : memref<8x512xf32, #tpu.memory_space<vmem>>, vector<8x512xf32>,
    return
  }
  func.func @transform_0(%arg0: i32, %arg1: i32) -> (i32, i32) {
    %c0_i32 = arith.constant 0 : i32
    return %arg0, %arg1 : i32, i32
  }
  func.func @transform_1(%arg0: i32, %arg1: i32) -> (i32, i32) {
    %c0_i32 = arith.constant 0 : i32
    %c0_i32_0 = arith.constant 0 : i32
    return %arg0, %c0_i32 : i32, i32
  }
  func.func @transform_2(%arg0: i32, %arg1: i32) -> (i32, i32) {
    %c0_i32 = arith.constant 0 : i32
    return %arg0, %arg1 : i32, i32
  }
}

</mosaic_0001>

<bundles_post_ra>
// kernel: tpu_custom_call.1
= control target key start
LH: loop header
LB: loop body
LE: loop exit
PB: predicated region body
PF: predicated region fallthrough
CT: control target
= control target key end

     0   :  { %7 = vsyncpa [#allocation3], 0  ;;  %s154_s0 = inlined_call_operand.hbm [shape: f32[8,512], index: 0, kind: input, shape index: {}, may-alias: {0,2}]   ;;  %s155_s1 = inlined_call_operand.vmem [shape: f32[8,1], index: 1, kind: input, shape index: {}]   ;;  %s156_s2 = inlined_call_operand.hbm [shape: f32[8,512], index: 2, kind: output, shape index: {}, may-alias: {0,2}]  }
   0x1   :  { %8 = vsyncpa [#allocation4], 0  ;;  %s109_s9 = smov [#allocation2]   ;;  %s61_s13 = scalar_lea.hbm %s154_s0, 512 }
   0x2   :  { %s15_s10 = sshll.u32 %s109_s9, 4  ;;  %p62_p0 = scmp.ne.s32.totalorder %s154_s0, %s61_s13  ;;  %s16_s10 = int_to_ptr.vmem [resolvable:$true] %s15_s10 }
   0x3   :  { %p65_p1 = scmp.lt.u32.totalorder %s61_s13, %s154_s0 }
   0x5   :  { %p67_p2 = pnand %p65_p1, %p62_p0 }
   0x7   :  { %70 = shalt.err (!%p67_p2)
}
   0x8   :  { %s71_s18 = scalar_lea.vmem %s16_s10, 512  ;;  %p76_p4 = scmp.lt.s32.totalorder %s16_s10, %s16_s10 }
   0x9   :  { %p72_p3 = scmp.ne.s32.totalorder %s16_s10, %s71_s18  ;;  %p77_p5 = scmp.lt.s32.totalorder %s71_s18, %s71_s18 }
   0xb   :  { %p78_p6 = por %p77_p5, %p76_p4 }
   0xd   :  { %p79_p7 = pnand %p78_p6, %p72_p3 }
   0xf   :  { %82 = shalt.err (!%p79_p7)
}
  0x10   :  { %18 = dma.hbm_to_vmem [thread:$0]  %s154_s0, 512, %s16_s10, [#allocation3]  }
  0x11   :  { %105 = dma.done.wait [#allocation3], 512  }
  0x12   :  { %106 = vsyncadd [#allocation3], 4294966784  ;;  %v110_v0 = vmov 0   ;;  %v28_v1 = vld [vmem:[%s155_s1] sm:$0xff]  ;;  %v25_v3 = vld [vmem:[#allocation2 + $0x8] sm:$0xff]  ;;  %s111_s23 = smov [#allocation5]  }
  0x13   :  { %60 = vset.pattern.permute.xlu0 %v110_v0  ;;  %v24_v2 = vld [vmem:[#allocation2] sm:$0xff]  ;;  %v26_v4 = vld [vmem:[#allocation2 + $0x10] sm:$0xff]  ;;  %v27_v5 = vld [vmem:[#allocation2 + $0x18] sm:$0xff]  ;;  %s48_s24 = sshll.u32 %s111_s23, 4  ;;  %s49_s24 = int_to_ptr.vmem [resolvable:$true] %s48_s24 }
  0x14   :  { %31 = vperm.xlu0 %60, %v28_v1   ;;  %s83_s0 = scalar_lea.vmem %s49_s24, 512  ;;  %p88_p9 = scmp.lt.s32.totalorder %s49_s24, %s49_s24 }
  0x15   :  { %p84_p8 = scmp.ne.s32.totalorder %s49_s24, %s83_s0  ;;  %p89_p10 = scmp.lt.s32.totalorder %s83_s0, %s83_s0 }
  0x17   :  { %p90_p11 = por %p89_p10, %p88_p9 }
  0x19   :  { %p91_p12 = pnand %p90_p11, %p84_p8 }
  0x93   :  { %v32_v6 = vpop.permute.xlu0 %31 }
  0x94   :  { %v34_v7 = vmul.f32 %v32_v6, %v24_v2  ;;  %v35_v8 = vmul.f32 %v32_v6, %v25_v3  ;;  %v36_v9 = vmul.f32 %v32_v6, %v26_v4  ;;  %v37_v10 = vmul.f32 %v32_v6, %v27_v5 }
  0x96   :  { %38 = vst [vmem:[#allocation5] sm:$0xff] %v34_v7  ;;  %39 = vst [vmem:[#allocation5 + $0x8] sm:$0xff] %v35_v8 }
  0x97   :  { %40 = vst [vmem:[#allocation5 + $0x10] sm:$0xff] %v36_v9  ;;  %41 = vst [vmem:[#allocation5 + $0x18] sm:$0xff] %v37_v10 }
  0x98   :  { %94 = shalt.err (!%p91_p12)
}
  0x99   :  { %s95_s26 = scalar_lea.hbm %s156_s2, 512 }
  0x9a   :  { %p96_p13 = scmp.ne.s32.totalorder %s156_s2, %s95_s26  ;;  %p99_p0 = scmp.lt.u32.totalorder %s95_s26, %s156_s2 }
  0x9c   :  { %p101_p1 = pnand %p99_p0, %p96_p13 }
  0x9e   :  { %104 = shalt.err (!%p101_p1)
}
  0x9f   :  { %51 = dma.vmem_to_hbm [thread:$0]  %s49_s24, 512, %s156_s2, [#allocation4]  }
  0xa0   :  { %107 = dma.done.wait [#allocation4], 512  }
  0xa1   :  { %108 = vsyncadd [#allocation4], 4294966784 }
  0xa2   :  { %55 = vsyncpa [#allocation3], 1 }
  0xa3   :  { %56 = vsyncpa [#allocation4], 1 }

</bundles_post_ra>
